<compile_context>
chip_gen: v7x
topology: tpu7x:2x2x1
jax: 0.10.0
libtpu: 0.0.40
codegen_flags: <defaults>
</compile_context>

<pallas_src>
import math

import jax
import jax.numpy as jnp
from jax.experimental import pallas as pl
from jax.experimental.pallas import tpu as pltpu


def _largest_divisor(n, cap, align=1):
    """Largest divisor of n that is <= cap and a multiple of `align` (else 1)."""
    cap = min(cap, n)
    for t in range(cap, 0, -1):
        if n % t == 0 and t % align == 0:
            return t
    return 1


def _vmem_capacity_bytes():
    """Physical VMEM per TensorCore; conservative fallback if unavailable."""
    try:
        cap = getattr(pltpu.get_tpu_info(), "vmem_capacity_bytes", None)
        if cap:
            return int(cap)
    except Exception:
        pass
    return 64 * 1024 * 1024          # v7x per-TC size (the most restrictive)


def _choose_tiles(B, L, C, D, io_itemsize, vmem_limit_bytes, target_block_bytes):
    """Pick (tb, tl) row tiles sized by bytes, not by a fixed row cap."""
    lane = 128
    c_pad = ((max(C, 1) + lane - 1) // lane) * lane   # skinny C pads to 128 lanes in VMEM
    d_pad = ((max(D, 1) + lane - 1) // lane) * lane
    # VMEM bytes per (batch*seq) row of one block:
    #   x + out blocks are double-buffered; the f32 matmul/add intermediate is not.
    per_row = 2 * io_itemsize * (c_pad + d_pad) + 4 * d_pad
    rows_vmem = max(8, int(0.6 * vmem_limit_bytes) // per_row)   # headroom for W/PE/internal scratch
    rows_target = max(8, target_block_bytes // (d_pad * io_itemsize))
    rows = min(rows_vmem, rows_target)

    # Prefer full-L tiles: contiguous x slab, PE fully resident, fewest DMAs.
    if L <= rows:
        tl = L
    else:
        tl = _largest_divisor(L, rows, align=8)
        if tl % 8 != 0:              # no aligned divisor -> full-L fallback (always legal)
            tl = L
    nl = max(1, L // tl)

    # Batch tile: as large as the row budget allows, but keep >= ~4 grid steps
    # (pipeline prologue/epilogue) and >= 2 tiles on a parallel axis (v7x: 2 TCs).
    tb_rows = max(1, rows // tl)
    total_cap = B * nl
    min_steps = 4 if total_cap >= 4 else min(2, total_cap)
    nb_needed = -(-min_steps // nl)                  # ceil
    tb_cap = max(1, B // max(1, nb_needed))
    tb = _largest_divisor(B, min(tb_rows, tb_cap))
    return tb, tl


def _data_embedding_kernel(x_ref, w_ref, b_ref, pe_ref, o_ref):
    # x_ref : (TB, TL, C)   io-dtype input tile
    # w_ref : (C, D)        io-dtype weight; block index constant -> resident
    # b_ref : (1, D)        f32 bias; resident
    # pe_ref: (TL, D)       io-dtype positional encoding for this L-tile
    # o_ref : (TB, TL, D)
    tb, tl, c = x_ref.shape
    d = w_ref.shape[1]
    # Skinny-K matmul on the MXU with f32 accumulation.  (An unrolled VPU
    # sum_k x[..., k] * w[k, :] would be near-neutral: the kernel is HBM-bound.)
    x2 = x_ref[...].reshape(tb * tl, c)
    y = jnp.dot(x2, w_ref[...], preferred_element_type=jnp.float32)
    y = y.reshape(tb, tl, d)
    # PE + bias add stays in f32 (v5e has no bf16 VALU); cast only at the store.
    y = y + pe_ref[...].astype(jnp.float32) + b_ref[...].astype(jnp.float32)
    o_ref[...] = y.astype(o_ref.dtype)


@jax.jit
def data_embedding(x, w_t, b, pe):
    """Eval-mode DataEmbedding forward.

    x   : (B, L, C)   activations; x.dtype sets the HBM-stream/output dtype
    w_t : (C, D)      torch Linear.weight.T
    b   : (D,)        torch Linear.bias
    pe  : (>=L, D)    PositionalEncoding buffer (only the first L rows are used)
    -> (B, L, D) in x.dtype
    """
    B, L, C = x.shape
    D = w_t.shape[1]
    assert pe.shape[0] >= L, "positional-encoding buffer shorter than sequence"
    assert pe.shape[1] == D and b.shape == (D,)

    io_dtype = x.dtype
    io_itemsize = jnp.dtype(io_dtype).itemsize

    # Per-generation VMEM budget (explicit limit is load-bearing on v5e, whose
    # default scoped VMEM is 16 MiB) and HBM-efficiency byte target per block.
    cap = _vmem_capacity_bytes()
    vmem_limit = int(min(cap * 5 // 8, 96 * 1024 * 1024))   # ~40 MiB @64 MiB/TC, ~80 MiB @128 MiB
    target_block = 4 * 1024 * 1024 if cap <= 64 * 1024 * 1024 else 8 * 1024 * 1024

    tb, tl = _choose_tiles(B, L, C, D, io_itemsize, vmem_limit, target_block)
    grid = (L // tl, B // tb)     # batch-tiles iterate fastest -> W/bias/PE block
                                  # indices are constant between consecutive
                                  # steps, so their re-DMA is skipped.

    # Parameters are tiny next to the (B, L, D) output stream; cast them only
    # if the caller did not pre-cast (hot-path callers should cast once,
    # outside this function, as demonstrated in __main__ for the bf16 path).
    if w_t.dtype != io_dtype:
        w_t = w_t.astype(io_dtype)
    if b.dtype != jnp.float32:
        b = b.astype(jnp.float32)
    b2 = b.reshape(1, D)
    pe_in = pe
    if pe_in.dtype != io_dtype:
        pe_in = (pe_in[:L] if pe_in.shape[0] != L else pe_in).astype(io_dtype)
    if pe_in.shape[0] != L and tl % 8 != 0:
        pe_in = pe_in[:L]         # rare fallback: keeps the (tl, D) block shape legal

    return pl.pallas_call(
        _data_embedding_kernel,
        out_shape=jax.ShapeDtypeStruct((B, L, D), io_dtype),
        grid_spec=pltpu.PrefetchScalarGridSpec(
            num_scalar_prefetch=0,
            grid=grid,
            in_specs=[
                pl.BlockSpec((tb, tl, C), lambda li, bi: (bi, li, 0)),   # x
                pl.BlockSpec((C, D), lambda li, bi: (0, 0)),             # weight (resident)
                pl.BlockSpec((1, D), lambda li, bi: (0, 0)),             # bias   (resident)
                pl.BlockSpec((tl, D), lambda li, bi: (li, 0)),           # PE
            ],
            out_specs=pl.BlockSpec((tb, tl, D), lambda li, bi: (bi, li, 0)),
        ),
        compiler_params=pltpu.CompilerParams(
            dimension_semantics=("parallel", "parallel"),   # megacore sharding (v7x)
            vmem_limit_bytes=vmem_limit,
        ),
    )(x, w_t, b2, pe_in)


def make_positional_encoding(max_len, d_model):
    """Matches the PyTorch PositionalEncoding buffer (even d_model)."""
    position = jnp.arange(0, max_len, dtype=jnp.float32)[:, None]      # (max_len, 1)
    div_term = jnp.exp(jnp.arange(0, d_model, 2, dtype=jnp.float32)
                       * (-math.log(10000.0) / d_model))               # (D/2,)
    pe = jnp.zeros((max_len, d_model), dtype=jnp.float32)
    pe = pe.at[:, 0::2].set(jnp.sin(position * div_term))
    pe = pe.at[:, 1::2].set(jnp.cos(position * div_term))
    return pe


if __name__ == "__main__":
    B, L, c_in, d_model = 2, 8, 4, 32
    max_len = 50                        # PE buffer longer than L, like the torch module

    key = jax.random.PRNGKey(0)
    kx, kw, kb = jax.random.split(key, 3)

    x = jax.random.normal(kx, (B, L, c_in), dtype=jnp.float32)

    # Deterministic parameter init (uniform like torch.nn.Linear default).
    bound = 1.0 / math.sqrt(c_in)
    # torch Linear.weight is (d_model, c_in); stored transposed as (c_in, d_model).
    w_t = jax.random.uniform(kw, (c_in, d_model), jnp.float32, -bound, bound)
    b = jax.random.uniform(kb, (d_model,), jnp.float32, -bound, bound)
    pe = make_positional_encoding(max_len, d_model)

    # Reference in plain JAX (eval-mode dropout == identity).
    ref = x @ w_t + b[None, None, :] + pe[None, :L, :]

    # 1) exact-numerics path (f32 HBM streams).
    out_f32 = jax.block_until_ready(data_embedding(x, w_t, b, pe))
    assert out_f32.shape == (B, L, d_model) and out_f32.dtype == jnp.float32
    assert jnp.allclose(out_f32, ref, atol=1e-5, rtol=1e-5)

    # 2) bandwidth path (bf16 HBM streams, f32 accumulation in-kernel).
    #    Parameters are pre-cast once here, outside the per-call path.
    x_bf16, w_bf16, pe_bf16 = (a.astype(jnp.bfloat16) for a in (x, w_t, pe))
    out_bf16 = jax.block_until_ready(data_embedding(x_bf16, w_bf16, b, pe_bf16))
    assert out_bf16.shape == (B, L, d_model) and out_bf16.dtype == jnp.bfloat16
    assert jnp.allclose(out_bf16.astype(jnp.float32), ref, atol=5e-2, rtol=5e-2)

    print("KERNEL_OK")
</pallas_src>

<mosaic_0001>
module attributes {stable_mosaic.version = 11 : i64} {
  func.func @_data_embedding_kernel(%arg0: i32, %arg1: i32, %arg2: memref<1x8x4xf32, #tpu.memory_space<vmem>>, %arg3: memref<4x32xf32, #tpu.memory_space<vmem>>, %arg4: memref<1x32xf32, #tpu.memory_space<vmem>>, %arg5: memref<8x32xf32, #tpu.memory_space<vmem>>, %arg6: memref<1x8x32xf32, #tpu.memory_space<vmem>>) attributes {dimension_semantics = [#tpu.dimension_semantics<parallel>, #tpu.dimension_semantics<parallel>], iteration_bounds = array<i64: 1, 2>, scalar_prefetch = 0 : i64, scratch_operands = 0 : i64, tpu.core_type = #tpu.core_type<tc>, window_params = [{transform_indices = @transform_0, window_bounds = array<i64: 1, 8, 4>}, {pipeline_mode = #tpu.pipeline_mode<synchronous>, transform_indices = @transform_1, window_bounds = array<i64: 4, 32>}, {pipeline_mode = #tpu.pipeline_mode<synchronous>, transform_indices = @transform_2, window_bounds = array<i64: 1, 32>}, {transform_indices = @transform_3, window_bounds = array<i64: 8, 32>}, {transform_indices = @transform_4, window_bounds = array<i64: 1, 8, 32>}]} {
    %c0 = arith.constant 0 : index
    %c0_0 = arith.constant 0 : index
    %c0_1 = arith.constant 0 : index
    %0 = vector.load %arg2[%c0, %c0_0, %c0_1] : memref<1x8x4xf32, #tpu.memory_space<vmem>>, vector<1x8x4xf32>
    %1 = vector.shape_cast %0 : vector<1x8x4xf32> to vector<8x4xf32>
    %c0_2 = arith.constant 0 : index
    %c0_3 = arith.constant 0 : index
    %2 = vector.load %arg3[%c0_2, %c0_3] : memref<4x32xf32, #tpu.memory_space<vmem>>, vector<4x32xf32>
    %cst = arith.constant dense<0.000000e+00> : vector<8x32xf32>
    %3 = tpu.matmul %1, %2, %cst {dimension_numbers = #tpu.dot_dimension_numbers<[1], [0], [0], [1], [0, 0, 1, 1], [], []>} : vector<8x4xf32>, vector<4x32xf32>, vector<8x32xf32> -> vector<8x32xf32>
    %4 = vector.shape_cast %3 : vector<8x32xf32> to vector<1x8x32xf32>
    %c0_4 = arith.constant 0 : index
    %c0_5 = arith.constant 0 : index
    %5 = vector.load %arg5[%c0_4, %c0_5] : memref<8x32xf32, #tpu.memory_space<vmem>>, vector<8x32xf32>
    %6 = vector.shape_cast %5 : vector<8x32xf32> to vector<1x8x32xf32>
    %7 = arith.addf %4, %6 : vector<1x8x32xf32>
    %c0_6 = arith.constant 0 : index
    %c0_7 = arith.constant 0 : index
    %8 = vector.load %arg4[%c0_6, %c0_7] : memref<1x32xf32, #tpu.memory_space<vmem>>, vector<1x32xf32>
    %9 = vector.shape_cast %8 : vector<1x32xf32> to vector<1x1x32xf32>
    %10 = vector.broadcast %9 : vector<1x1x32xf32> to vector<1x8x32xf32>
    %11 = arith.addf %7, %10 : vector<1x8x32xf32>
    %c0_8 = arith.constant 0 : index
    %c0_9 = arith.constant 0 : index
    %c0_10 = arith.constant 0 : index
    %12 = vector.load %arg6[%c0_8, %c0_9, %c0_10] : memref<1x8x32xf32, #tpu.memory_space<vmem>>, vector<1x8x32xf32>
    tpu.vector_store %arg6[%c0_8, %c0_9, %c0_10], %11 {strides = array<i32>} : memref<1x8x32xf32, #tpu.memory_space<vmem>>, vector<1x8x32xf32>,
    return
  }
  func.func @transform_0(%arg0: i32, %arg1: i32) -> (i32, i32, i32) {
    %c0_i32 = arith.constant 0 : i32
    %c0_i32_0 = arith.constant 0 : i32
    return %arg1, %arg0, %c0_i32 : i32, i32, i32
  }
  func.func @transform_1(%arg0: i32, %arg1: i32) -> (i32, i32) {
    %c0_i32 = arith.constant 0 : i32
    %c0_i32_0 = arith.constant 0 : i32
    %c0_i32_1 = arith.constant 0 : i32
    return %c0_i32, %c0_i32_0 : i32, i32
  }
  func.func @transform_2(%arg0: i32, %arg1: i32) -> (i32, i32) {
    %c0_i32 = arith.constant 0 : i32
    %c0_i32_0 = arith.constant 0 : i32
    %c0_i32_1 = arith.constant 0 : i32
    return %c0_i32, %c0_i32_0 : i32, i32
  }
  func.func @transform_3(%arg0: i32, %arg1: i32) -> (i32, i32) {
    %c0_i32 = arith.constant 0 : i32
    %c0_i32_0 = arith.constant 0 : i32
    return %arg0, %c0_i32 : i32, i32
  }
  func.func @transform_4(%arg0: i32, %arg1: i32) -> (i32, i32, i32) {
    %c0_i32 = arith.constant 0 : i32
    %c0_i32_0 = arith.constant 0 : i32
    return %arg1, %arg0, %c0_i32 : i32, i32, i32
  }
}

</mosaic_0001>

<bundles_post_ra>
// kernel: data_embedding.1
= control target key start
LH: loop header
LB: loop body
LE: loop exit
PB: predicated region body
PF: predicated region fallthrough
CT: control target
= control target key end

     0   :  { %9 = vsyncpa [#allocation3], 0  ;;  %s736_s0 = inlined_call_operand.vmem [shape: f32[2,8,4], index: 0, kind: input, shape index: {}]   ;;  %s737_s1 = inlined_call_operand.vmem [shape: f32[4,32], index: 1, kind: input, shape index: {}]   ;;  %s738_s2 = inlined_call_operand.vmem [shape: f32[1,32], index: 2, kind: input, shape index: {}]   ;;  %s739_s3 = inlined_call_operand.vmem [shape: f32[50,32], index: 3, kind: input, shape index: {}]   ;;  %s740_s4 = inlined_call_operand.hbm [shape: f32[2,8,32], index: 4, kind: output, shape index: {}]  }
   0x1   :  { %11 = vsyncpa [#allocation3 + $0x1], 0  ;;  %s615_s15 = smov 0   ;;  %s617_s16 = smov 0  }
   0x2   :  { %s619_s17 = smov 0   ;;  %s621_s18 = smov 0  }
   0x3   :  { %s623_s19 = smov 0   ;;  %s625_s20 = smov 0  }
   0x4 LB: > { %s428_s21 = sadd.s32 4294967295, %s585_s20   ;;  %s429_s22 = sadd.s32 4294967294, %s585_s20   ;;  %s585_s20 = sphi %s625_s20, %s17_s20   ;;  %s581_s19 = sphi %s623_s19, %s747_s19   ;;  %s577_s18 = sphi %s621_s18, %s746_s18   ;;  %s573_s17 = sphi %s619_s17, %s745_s17   ;;  %s569_s16 = sphi %s617_s16, %s744_s16   ;;  %s565_s15 = sphi %s615_s15, %s743_s15  }
   0x5   : > { %s26_s23 = sadd.s32 1, %s581_s19  ;;  %s134_s24 = sadd.s32 1, %s573_s17 }
   0x6   : > { %p27_p0 = scmp.ge.s32.totalorder %s26_s23, 2  ;;  %p144_p1 = scmp.ne.s32.totalorder %s573_s17, %s569_s16 }
   0x7   : > { %p145_p2 = scmp.eq.s32.totalorder %s428_s21, 1  ;;  %p150_p3 = scmp.ne.s32.totalorder %s569_s16, %s565_s15 }
   0x8   : > { %s749_s23 = smov (%p27_p0, %s26_s23), 0  ;;  %p151_p5 = scmp.eq.s32.totalorder %s429_s22, 1 }
   0x9   : > { %p655_p4 = por %p145_p2, %p144_p1  ;;  %s129_s26 = ssub.s32 %s581_s19, %s749_s23 }
   0xa   : > { %p433_p6 = scmp.ge.s32.totalorder %s585_s20, 1  ;;  %p132_p7 = scmp.eq.s32.totalorder %s129_s26, 0 }
   0xb   : > { %p662_p8 = por %p151_p5, %p150_p3  ;;  %p192_p9 = scmp.lt.s32.totalorder %s585_s20, 3 }
   0xc   : > { %s668_s28 = scalar_select %p132_p7, %s573_s17, %s134_s24  }
   0xd   : > { %p193_p10 = pnand %p433_p6, %p192_p9 }
   0xe   : > { %v236_v0 = vld [vmem:[%s737_s1] sm:$0xf] (!%p193_p10)  ;;  %vm241_vm0 = vcmask (!%p193_p10), 1043456   ;;  %p224_p11 = scmp.lt.s32.totalorder (!%p193_p10), %s577_s18, 1  ;;  %v587_v1 = vmov (!%p193_p10), 0.0   ;;  %vm588_vm1 = vmmov (!%p193_p10), 0  }
   0xf   : > { %196 = sbr.rel (%p193_p10) target bundleno = 257 (0x101), region = 36  ;;  %445 = vmatprep.subr.mxu0 (!%p193_p10), %v587_v1  ;;  %447 = vmatprep.mubr.msk.f32.mxu0 (!%p193_p10), %vm588_vm1, %v587_v1  ;;  %vm237_vm2 = vcmask (!%p193_p10), 31744   ;;  %s221_s10 = sand.u32 (!%p193_p10), 1, %s569_s16   ;;  %v315_v3 = vld [vmem:[%s739_s3] sm:$0xff] (!%p193_p10)  ;;  %vm325_vm3 = vcmask (!%p193_p10), 261120  }
  0x10   : > { %446 = vmatpush3.msk.msra.mxu0 (!%p193_p10), %vm241_vm0, %v236_v0  ;;  %s434_s11 = sshll.u32 (!%p193_p10), %s221_s10, 3  ;;  %v438_v5 = vld [vmem:[%s738_s2] ss:$0 sm:$0xff] (!%p193_p10)  ;;  %s440_s22 = sshll.u32 (!%p193_p10), %s577_s18, 7 }
  0x11   : > { %s223_s24 = scalar_lea.vmem (!%p193_p10), [#allocation2], %s434_s11 }
  0x12   : > { %s342_s26 = sshll.u32 (!%p193_p10), %s223_s24, 4  ;;  %s691_s26 = int_to_ptr.vmem [resolvable:$true] %s342_s26 }
  0x13   : > { %s507_s7 = scalar_lea.vmem (!%p193_p10), %s691_s26, 128 }
  0x14   : > { %p508_p12 = scmp.ne.s32.totalorder (!%p193_p10), %s691_s26, %s507_s7 }
  0x16   : > { %s225_s5 = scalar_select %p224_p11, %s577_s18, 1 }
  0x17   : > { %p509_p13 = pnand %p508_p12, %p655_p4  ;;  %s589_s18 = smov [#allocation2]  }
  0x18   : > { %s435_s6 = sshll.u32 %s225_s5, 3  ;;  %s689_s5 = scalar_lea.hbm %s740_s4, %s440_s22 }
  0x19   : > { %s230_s9 = scalar_lea.vmem %s736_s0, %s435_s6  ;;  %s328_s6 = scalar_lea.sflag [#allocation3], %s221_s10 }
  0x1a   : > { %v235_v2 = vld [vmem:[%s230_s9] sm:$0xff]  ;;  %p510_p0 = pneg %p509_p13  ;;  %s511_s8 = sshll.u32 %s589_s18, 4  ;;  %s512_s8 = int_to_ptr.vmem [resolvable:$false] %s511_s8 }
  0x1b   : > { %448 = vmatmul.mubr.msk.f32.vlgmr.msra.gmra.mrb[0].mxu0 %vm237_vm2, %v235_v2  ;;  %s513_s9 = scalar_lea.vmem %s512_s8, 256  ;;  %p514_p1 = scmp.lt.s32.totalorder %s691_s26, %s512_s8 }
  0x1c   : > { %p515_p2 = scmp.lt.s32.totalorder %s513_s9, %s507_s7 }
  0x1e   : > { %p516_p3 = por %p515_p2, %p514_p1 }
  0x20   : > { %p517_p5 = pnand %p516_p3, %p510_p0 }
  0xee   : > { %v311_v4 = vpop.f32.mrb[0].mxu0 }
  0xef   : > { %v316_v6 = vadd.f32 %v315_v3, %v311_v4  ;;  %v449_v7 = vpop.f32.mrb[1].mxu0 }
  0xf1   : > { %v324_v8 = vadd.f32 %v438_v5, %v316_v6 }
  0xf3   : > { %326 = vst.msk [vmem:[%s223_s24] sm:$0xff] %vm325_vm3, %v324_v8 }
  0xf4   : > { %520 = shalt.err (!%p517_p5)
}
  0xf5   : > { %s521_s10 = scalar_lea.hbm %s689_s5, 128  ;;  %s525_s13 = scalar_lea.hbm %s740_s4, 256 }
  0xf6   : > { %p522_p6 = scmp.ne.s32.totalorder %s689_s5, %s521_s10  ;;  %p526_p10 = scmp.lt.u32.totalorder %s689_s5, %s740_s4 }
  0xf7   : > { %p527_p11 = scmp.lt.u32.totalorder %s525_s13, %s521_s10  ;;  %p529_p13 = scmp.lt.u32.totalorder %s521_s10, %s689_s5 }
  0xf8   : > { %p523_p7 = pnand %p522_p6, %p655_p4 }
  0xf9   : > { %p528_p12 = por %p527_p11, %p526_p10 }
  0xfa   : > { %p524_p9 = pneg %p523_p7 }
  0xfb   : > { %p530_p0 = por %p529_p13, %p528_p12 }
  0xfd   : > { %p531_p1 = pnand %p530_p0, %p524_p9 }
  0xff   : > { %534 = shalt.err (!%p531_p1)
}
 0x100   : > { %450 = dma.vmem_to_hbm [thread:$0]  (%p655_p4), %s691_s26, 128, %s689_s5, %s328_s6  }
 0x101 PF: > { %p456_p2 = scmp.ge.s32.totalorder %s585_s20, 2  ;;  %s354_s22 = sand.u32 1, %s565_s15  }
 0x102   : > { %s355_s24 = scalar_lea.sflag [#allocation3], %s354_s22 }
 0x103   : > { %p453_p3 = pnand %p456_p2, %p662_p8 }
 0x105   : > { %560 = dma.done.wait (!%p453_p3), %s355_s24, 128  }
 0x106   : > { %562 = vsyncadd (!%p453_p3), %s355_s24, 4294967168  ;;  %s17_s20 = sadd.s32 1, %s585_s20   ;;  %s743_s15 = smov %s569_s16 }
 0x107   : > { %p14_p5 = scmp.ge.s32.totalorder %s17_s20, 4   ;;  %s744_s16 = smov %s573_s17 }
 0x108   : > { %s745_s17 = smov %s668_s28  ;;  %s746_s18 = smov %s581_s19 }
 0x109   : > { %s747_s19 = smov %s749_s23  ;;  %16 = sbr.rel (!%p14_p5) target bundleno = 4 (0x4), region = 74 }
 0x110   :  { %360 = vsyncpa [#allocation3], 1 }
 0x111   :  { %362 = vsyncpa [#allocation3 + $0x1], 1 }

</bundles_post_ra>
